<compile_context>
chip_gen: v5e
topology: v5e:2x2
jax: 0.10.0
libtpu: 0.0.40
codegen_flags: <defaults>
</compile_context>

<pallas_src>
import jax
import jax.numpy as jnp
from jax.experimental import pallas as pl
from jax.experimental.pallas import tpu as pltpu


VO_DIM = 10  # VOnet.self.dim

LANES = 1024                 # preferred lane-dense last dim (multiple of 128)
MAX_BLOCK_COLS = 1024        # cap on column-block width
TARGET_TILE_BYTES = 8 << 20  # ~8 MiB per tile per buffer (dtype-independent)
VMEM_LIMIT_BYTES = 48 << 20  # > v5e's 16 MiB scoped default, < v7x 64 MiB physical
SMALL_N_THRESHOLD = 1 << 17  # below this, XLA's fused add beats kernel launch cost

# Sublane packing per itemsize -> row-block alignment.
_ROW_ALIGN = {1: 32, 2: 16, 4: 8, 8: 8}


def _add_dim_kernel(x_ref, o_ref):
    # Elementwise hot path: out = x + dim
    o_ref[...] = x_ref[...] + jnp.asarray(VO_DIM, dtype=x_ref.dtype)


def _round_up(a, b):
    return ((a + b - 1) // b) * b


def _copy_free_2d_view(x):
    """Lane-dense 2D view of x obtainable with zero data movement, or None."""
    n = x.size
    if n % LANES == 0:
        return x.reshape(n // LANES, LANES)
    c = x.shape[-1] if x.ndim >= 1 else 0
    if c >= 128 and c % 128 == 0:
        return x.reshape(n // c, c)
    return None


def _vonet_pallas_2d(x2):
    rows, cols = x2.shape
    itemsize = jnp.dtype(x2.dtype).itemsize
    row_align = _ROW_ALIGN.get(itemsize, 8)

    # Column blocking: full extent if it fits, else 1024-wide blocks
    # (multiple of 128, ragged last column block is masked by Pallas).
    block_cols = cols if cols <= MAX_BLOCK_COLS else MAX_BLOCK_COLS

    # Dtype-aware row budget keeping the tile at ~TARGET_TILE_BYTES.
    budget_rows = max(
        row_align,
        (TARGET_TILE_BYTES // (block_cols * itemsize)) // row_align * row_align,
    )

    if rows <= budget_rows:
        if rows >= 2 * row_align:
            # Split into (at least) 2 row blocks so a "parallel" grid can use
            # both TensorCores on v7x; last block may be ragged (masked).
            block_rows = _round_up(pl.cdiv(rows, 2), row_align)
        else:
            block_rows = rows  # full extent: always a legal block shape
    else:
        block_rows = budget_rows

    grid = (pl.cdiv(rows, block_rows), pl.cdiv(cols, block_cols))

    return pl.pallas_call(
        _add_dim_kernel,
        out_shape=jax.ShapeDtypeStruct((rows, cols), x2.dtype),
        grid=grid,
        in_specs=[pl.BlockSpec((block_rows, block_cols), lambda r, c: (r, c))],
        out_specs=pl.BlockSpec((block_rows, block_cols), lambda r, c: (r, c)),
        compiler_params=pltpu.CompilerParams(
            dimension_semantics=("parallel", "parallel"),
            vmem_limit_bytes=VMEM_LIMIT_BYTES,
        ),
    )(x2)


def vonet_forward(x):
    """Pallas implementation of VOnet.forward: x + 10 (any shape/dtype)."""
    n = x.size
    if n == 0 or n < SMALL_N_THRESHOLD:
        # Empty / tiny input: plain fused XLA add (kernel launch would dominate).
        return x + jnp.asarray(VO_DIM, dtype=x.dtype)

    x2 = _copy_free_2d_view(x)
    if x2 is None:
        # No copy-free lane-dense view exists; pad+slice would add extra HBM
        # passes, so the single fused XLA add is the roofline-optimal choice.
        return x + jnp.asarray(VO_DIM, dtype=x.dtype)

    out2 = _vonet_pallas_2d(x2)
    return out2.reshape(x.shape)


if __name__ == "__main__":
    key = jax.random.PRNGKey(0)
    k1, k2, k3, k4 = jax.random.split(key, 4)

    cases = [
        # 1) tiny input -> XLA short-circuit path
        jax.random.normal(k1, (2, 4, 16, 16), dtype=jnp.float32),
        # 2) n % 1024 == 0 -> primary Pallas path, 2 row blocks (2-TC friendly)
        jax.random.normal(k2, (2, 8, 128, 128), dtype=jnp.float32),
        # 3) last dim multiple of 128, n % 1024 != 0, bf16 -> secondary Pallas
        #    path with dtype-aware row blocks and a ragged (masked) last block
        jax.random.normal(k3, (349, 384), dtype=jnp.bfloat16),
        # 4) fully ragged shape (no copy-free lane-dense view) -> XLA fallback
        jax.random.normal(k4, (1000, 777), dtype=jnp.float32),
    ]

    for x in cases:
        out = jax.block_until_ready(vonet_forward(x))
        ref = x + jnp.asarray(VO_DIM, dtype=x.dtype)
        assert out.shape == x.shape and out.dtype == x.dtype
        assert jnp.array_equal(out, ref)

    print("KERNEL_OK")
</pallas_src>

<mosaic_0001>
module attributes {stable_mosaic.version = 11 : i64} {
  func.func @_add_dim_kernel(%arg0: i32, %arg1: i32, %arg2: memref<128x1024xf32, #tpu.memory_space<vmem>>, %arg3: memref<128x1024xf32, #tpu.memory_space<vmem>>) attributes {dimension_semantics = [#tpu.dimension_semantics<parallel>, #tpu.dimension_semantics<parallel>], iteration_bounds = array<i64: 2, 1>, scalar_prefetch = 0 : i64, scratch_operands = 0 : i64, tpu.core_type = #tpu.core_type<tc>, window_params = [{transform_indices = @transform_0, window_bounds = array<i64: 128, 1024>}, {transform_indices = @transform_1, window_bounds = array<i64: 128, 1024>}]} {
    %c0 = arith.constant 0 : index
    %c0_0 = arith.constant 0 : index
    %0 = vector.load %arg2[%c0, %c0_0] : memref<128x1024xf32, #tpu.memory_space<vmem>>, vector<128x1024xf32>
    %cst = arith.constant 1.000000e+01 : f32
    %1 = vector.broadcast %cst : f32 to vector<128x1024xf32>
    %2 = arith.addf %0, %1 : vector<128x1024xf32>
    %c0_1 = arith.constant 0 : index
    %c0_2 = arith.constant 0 : index
    %3 = vector.load %arg3[%c0_1, %c0_2] : memref<128x1024xf32, #tpu.memory_space<vmem>>, vector<128x1024xf32>
    tpu.vector_store %arg3[%c0_1, %c0_2], %2 {strides = array<i32>} : memref<128x1024xf32, #tpu.memory_space<vmem>>, vector<128x1024xf32>,
    return
  }
  func.func @transform_0(%arg0: i32, %arg1: i32) -> (i32, i32) {
    %c0_i32 = arith.constant 0 : i32
    return %arg0, %arg1 : i32, i32
  }
  func.func @transform_1(%arg0: i32, %arg1: i32) -> (i32, i32) {
    %c0_i32 = arith.constant 0 : i32
    return %arg0, %arg1 : i32, i32
  }
}

</mosaic_0001>

<bundles_post_ra>
// kernel: tpu_custom_call.1
= control target key start
LH: loop header
LB: loop body
LE: loop exit
PB: predicated region body
PF: predicated region fallthrough
CT: control target
= control target key end

     0   :  { %6 = vsyncpa [#allocation3], 0  ;;  %s1246_s0 = inlined_call_operand.hbm [shape: f32[256,1024], index: 0, kind: input, shape index: {}]   ;;  %s1247_s1 = inlined_call_operand.hbm [shape: f32[256,1024], index: 1, kind: output, shape index: {}]  }
   0x1   :  { %8 = vsyncpa [#allocation3 + $0x1], 0 }
   0x2   :  { %9 = vsyncpa [#allocation4], 0 }
   0x3   :  { %11 = vsyncpa [#allocation4 + $0x1], 0  ;;  %s865_s6 = smov 0   ;;  %s867_s7 = smov 0  }
   0x4   :  { %s869_s8 = smov 0   ;;  %s871_s9 = smov 0  }
   0x5   :  { %s873_s10 = smov 0   ;;  %s875_s11 = smov 0  }
   0x6 LB: > { %s650_s12 = sadd.s32 4294967295, %s849_s11   ;;  %s651_s13 = sadd.s32 4294967294, %s849_s11   ;;  %s849_s11 = sphi %s875_s11, %s17_s11   ;;  %s845_s10 = sphi %s873_s10, %s1256_s10   ;;  %s841_s9 = sphi %s871_s9, %s1255_s9   ;;  %s837_s8 = sphi %s869_s8, %s1254_s8   ;;  %s833_s7 = sphi %s867_s7, %s1253_s7   ;;  %s829_s6 = sphi %s865_s6, %s1252_s6  }
   0x7   : > { %s29_s14 = sadd.s32 1, %s845_s10  ;;  %s38_s15 = sadd.s32 1, %s837_s8 }
   0x8   : > { %p31_p0 = scmp.ge.s32.totalorder %s29_s14, 2  ;;  %p45_p1 = scmp.ne.s32.totalorder %s837_s8, %s833_s7 }
   0x9   : > { %p46_p2 = scmp.eq.s32.totalorder %s849_s11, 0  ;;  %p51_p3 = scmp.ne.s32.totalorder %s833_s7, %s829_s6 }
   0xa   : > { %s1258_s14 = smov (%p31_p0, %s29_s14), 0  ;;  %p52_p5 = scmp.eq.s32.totalorder %s650_s12, 0 }
   0xb   : > { %p906_p4 = por %p46_p2, %p45_p1  ;;  %s33_s17 = ssub.s32 %s845_s10, %s1258_s14 }
   0xc   : > { %p77_p6 = scmp.eq.s32.totalorder %s650_s12, 1  ;;  %p36_p7 = scmp.eq.s32.totalorder %s33_s17, 0 }
   0xd   : > { %p912_p8 = por %p52_p5, %p51_p3  ;;  %p83_p10 = scmp.eq.s32.totalorder %s651_s13, 1 }
   0xe   : > { %p916_p9 = por %p77_p6, %p45_p1  ;;  %p653_p12 = scmp.ge.s32.totalorder %s849_s11, 2 }
   0xf   : > { %s921_s20 = scalar_select %p36_p7, %s837_s8, %s38_s15  }
  0x10   : > { %p923_p11 = por %p83_p10, %p51_p3  ;;  %p683_p13 = scmp.lt.s32.totalorder %s849_s11, 2 }
  0x11   : > { %s103_s22 = sand.u32 1, %s837_s8   ;;  %s668_s24 = sshll.u32 %s845_s10, 10 }
  0x12   : > { %s654_s23 = sshll.u32 %s103_s22, 10  ;;  %s115_s27 = scalar_lea.hbm %s1246_s0, %s668_s24 }
  0x13   : > { %s107_s28 = scalar_lea.vmem [#allocation2], %s654_s23  ;;  %s116_s30 = sshll.u32 %s115_s27, 4  ;;  %s117_s30 = int_to_ptr.hbm [resolvable:$true] %s116_s30 }
  0x14   : > { %s118_s29 = sshll.u32 %s107_s28, 4  ;;  %p676_p0 = pnand %p683_p13, %p906_p4  ;;  %s119_s29 = int_to_ptr.vmem [resolvable:$true] %s118_s29 }
  0x15   : > { %p658_p1 = scmp.ge.s32.totalorder %s849_s11, 1  ;;  %s104_s2 = scalar_lea.sflag [#allocation3], %s103_s22 }
  0x16   : > { %s851_s3 = smov 1024   ;;  %s852_s4 = smov 64  }
  0x17   : > { %678 = dma.hbm_to_vmem [thread:$0]  (!%p676_p0), %s117_s30, 16384, %s119_s29, %s104_s2, %s851_s3, %s851_s3, %s852_s4  }
  0x18   : > { %p126_p2 = scmp.lt.s32.totalorder %s849_s11, 3 }
  0x1a   : > { %p127_p3 = pnand %p658_p1, %p126_p2 }
  0x1b   : > { %s939_s5 = sand.u32 (!%p127_p3), 1, %s833_s7  }
  0x1c   : > { %130 = sbr.rel (%p127_p3) target bundleno = 168 (0xa8), region = 24  ;;  %s659_s12 = sshll.u32 (!%p127_p3), %s939_s5, 10 }
  0x1d   : > { %s133_s13 = scalar_lea.sflag (!%p127_p3), [#allocation3], %s939_s5  ;;  %s943_s15 = scalar_lea.vmem (!%p127_p3), [#allocation2], %s659_s12 }
  0x21   : > { %820 = dma.done.wait (%p912_p8), %s133_s13, 16384  }
  0x22   : > { %822 = vsyncadd (%p912_p8), %s133_s13, 4294950912  ;;  %v160_v0 = vld [vmem:[%s943_s15] sm:$0xff]  ;;  %v161_v1 = vld [vmem:[%s943_s15 + $0x8] sm:$0xff]  ;;  %s956_s16 = scalar_lea.vmem [#allocation5], %s659_s12  ;;  %s670_s17 = sshll.u32 %s841_s9, 10 }
  0x23   : > { %v162_v2 = vld [vmem:[%s943_s15 + $0x10] sm:$0xff]  ;;  %v288_v3 = vadd.f32 10.0, %v160_v0  ;;  %v289_v4 = vadd.f32 10.0, %v161_v1  ;;  %v163_v6 = vld [vmem:[%s943_s15 + $0x18] sm:$0xff]  ;;  %v164_v7 = vld [vmem:[%s943_s15 + $0x20] sm:$0xff]  ;;  %s559_s23 = scalar_lea.hbm %s1247_s1, %s670_s17  ;;  %s560_s9 = sshll.u32 %s956_s16, 4  ;;  %s561_s9 = int_to_ptr.vmem [resolvable:$true] %s560_s9 }
  0x24   : > { %v290_v5 = vadd.f32 10.0, %v162_v2  ;;  %v165_v8 = vld [vmem:[%s943_s15 + $0x28] sm:$0xff]  ;;  %v291_v9 = vadd.f32 10.0, %v163_v6  ;;  %v166_v10 = vld [vmem:[%s943_s15 + $0x30] sm:$0xff]  ;;  %v292_v11 = vadd.f32 10.0, %v164_v7  ;;  %v167_v12 = vld [vmem:[%s943_s15 + $0x38] sm:$0xff] }
  0x25   : > { %416 = vst [vmem:[%s956_s16] sm:$0xff] %v288_v3  ;;  %v293_v13 = vadd.f32 10.0, %v165_v8  ;;  %v168_v14 = vld [vmem:[%s943_s15 + $0x40] sm:$0xff]  ;;  %v294_v15 = vadd.f32 10.0, %v166_v10  ;;  %v169_v16 = vld [vmem:[%s943_s15 + $0x48] sm:$0xff]  ;;  %v295_v17 = vadd.f32 10.0, %v167_v12  ;;  %v170_v18 = vld [vmem:[%s943_s15 + $0x50] sm:$0xff] }
  0x26   : > { %417 = vst [vmem:[%s956_s16 + $0x8] sm:$0xff] %v289_v4  ;;  %v296_v19 = vadd.f32 10.0, %v168_v14  ;;  %v171_v20 = vld [vmem:[%s943_s15 + $0x58] sm:$0xff]  ;;  %v297_v21 = vadd.f32 10.0, %v169_v16  ;;  %v172_v22 = vld [vmem:[%s943_s15 + $0x60] sm:$0xff]  ;;  %v298_v23 = vadd.f32 10.0, %v170_v18 }
  0x27   : > { %418 = vst [vmem:[%s956_s16 + $0x10] sm:$0xff] %v290_v5  ;;  %v173_v24 = vld [vmem:[%s943_s15 + $0x68] sm:$0xff]  ;;  %v299_v25 = vadd.f32 10.0, %v171_v20  ;;  %v174_v26 = vld [vmem:[%s943_s15 + $0x70] sm:$0xff]  ;;  %v300_v27 = vadd.f32 10.0, %v172_v22  ;;  %v175_v28 = vld [vmem:[%s943_s15 + $0x78] sm:$0xff] }
  0x28   : > { %419 = vst [vmem:[%s956_s16 + $0x18] sm:$0xff] %v291_v9  ;;  %v301_v29 = vadd.f32 10.0, %v173_v24  ;;  %v176_v30 = vld [vmem:[%s943_s15 + $0x80] sm:$0xff]  ;;  %v302_v31 = vadd.f32 10.0, %v174_v26  ;;  %v177_v32 = vld [vmem:[%s943_s15 + $0x88] sm:$0xff]  ;;  %v303_v33 = vadd.f32 10.0, %v175_v28 }
  0x29   : > { %420 = vst [vmem:[%s956_s16 + $0x20] sm:$0xff] %v292_v11  ;;  %v178_v34 = vld [vmem:[%s943_s15 + $0x90] sm:$0xff]  ;;  %v304_v35 = vadd.f32 10.0, %v176_v30  ;;  %v179_v36 = vld [vmem:[%s943_s15 + $0x98] sm:$0xff]  ;;  %v305_v37 = vadd.f32 10.0, %v177_v32  ;;  %v180_v38 = vld [vmem:[%s943_s15 + $0xa0] sm:$0xff] }
  0x2a   : > { %421 = vst [vmem:[%s956_s16 + $0x28] sm:$0xff] %v293_v13  ;;  %v306_v39 = vadd.f32 10.0, %v178_v34  ;;  %v181_v40 = vld [vmem:[%s943_s15 + $0xa8] sm:$0xff]  ;;  %v307_v41 = vadd.f32 10.0, %v179_v36  ;;  %v182_v42 = vld [vmem:[%s943_s15 + $0xb0] sm:$0xff]  ;;  %v308_v43 = vadd.f32 10.0, %v180_v38 }
  0x2b   : > { %422 = vst [vmem:[%s956_s16 + $0x30] sm:$0xff] %v294_v15  ;;  %v183_v44 = vld [vmem:[%s943_s15 + $0xb8] sm:$0xff]  ;;  %v309_v45 = vadd.f32 10.0, %v181_v40  ;;  %v184_v46 = vld [vmem:[%s943_s15 + $0xc0] sm:$0xff]  ;;  %v310_v47 = vadd.f32 10.0, %v182_v42  ;;  %v185_v48 = vld [vmem:[%s943_s15 + $0xc8] sm:$0xff] }
  0x2c   : > { %423 = vst [vmem:[%s956_s16 + $0x38] sm:$0xff] %v295_v17  ;;  %v311_v49 = vadd.f32 10.0, %v183_v44  ;;  %v186_v50 = vld [vmem:[%s943_s15 + $0xd0] sm:$0xff]  ;;  %v312_v51 = vadd.f32 10.0, %v184_v46  ;;  %v187_v52 = vld [vmem:[%s943_s15 + $0xd8] sm:$0xff]  ;;  %v313_v53 = vadd.f32 10.0, %v185_v48 }
  0x2d   : > { %424 = vst [vmem:[%s956_s16 + $0x40] sm:$0xff] %v296_v19  ;;  %v188_v54 = vld [vmem:[%s943_s15 + $0xe0] sm:$0xff]  ;;  %v314_v55 = vadd.f32 10.0, %v186_v50  ;;  %v189_v56 = vld [vmem:[%s943_s15 + $0xe8] sm:$0xff]  ;;  %v315_v57 = vadd.f32 10.0, %v187_v52  ;;  %v190_v58 = vld [vmem:[%s943_s15 + $0xf0] sm:$0xff] }
  0x2e   : > { %425 = vst [vmem:[%s956_s16 + $0x48] sm:$0xff] %v297_v21  ;;  %v316_v59 = vadd.f32 10.0, %v188_v54  ;;  %v191_v60 = vld [vmem:[%s943_s15 + $0xf8] sm:$0xff]  ;;  %v317_v61 = vadd.f32 10.0, %v189_v56  ;;  %v192_v62 = vld [vmem:[%s943_s15 + $0x100] sm:$0xff]  ;;  %v318_v63 = vadd.f32 10.0, %v190_v58 }
  0x2f   : > { %426 = vst [vmem:[%s956_s16 + $0x50] sm:$0xff] %v298_v23  ;;  %v193_v0 = vld [vmem:[%s943_s15 + $0x108] sm:$0xff]  ;;  %v319_v1 = vadd.f32 10.0, %v191_v60  ;;  %v194_v2 = vld [vmem:[%s943_s15 + $0x110] sm:$0xff]  ;;  %v320_v3 = vadd.f32 10.0, %v192_v62  ;;  %v195_v4 = vld [vmem:[%s943_s15 + $0x118] sm:$0xff] }
  0x30   : > { %427 = vst [vmem:[%s956_s16 + $0x58] sm:$0xff] %v299_v25  ;;  %v321_v5 = vadd.f32 10.0, %v193_v0  ;;  %v196_v6 = vld [vmem:[%s943_s15 + $0x120] sm:$0xff]  ;;  %v322_v7 = vadd.f32 10.0, %v194_v2  ;;  %v197_v8 = vld [vmem:[%s943_s15 + $0x128] sm:$0xff]  ;;  %v323_v9 = vadd.f32 10.0, %v195_v4 }
  0x31   : > { %428 = vst [vmem:[%s956_s16 + $0x60] sm:$0xff] %v300_v27  ;;  %v198_v10 = vld [vmem:[%s943_s15 + $0x130] sm:$0xff]  ;;  %v324_v11 = vadd.f32 10.0, %v196_v6  ;;  %v199_v12 = vld [vmem:[%s943_s15 + $0x138] sm:$0xff]  ;;  %v325_v13 = vadd.f32 10.0, %v197_v8  ;;  %v200_v14 = vld [vmem:[%s943_s15 + $0x140] sm:$0xff] }
  0x32   : > { %429 = vst [vmem:[%s956_s16 + $0x68] sm:$0xff] %v301_v29  ;;  %v326_v15 = vadd.f32 10.0, %v198_v10  ;;  %v201_v16 = vld [vmem:[%s943_s15 + $0x148] sm:$0xff]  ;;  %v327_v17 = vadd.f32 10.0, %v199_v12  ;;  %v202_v18 = vld [vmem:[%s943_s15 + $0x150] sm:$0xff]  ;;  %v328_v19 = vadd.f32 10.0, %v200_v14 }
  0x33   : > { %430 = vst [vmem:[%s956_s16 + $0x70] sm:$0xff] %v302_v31  ;;  %v203_v20 = vld [vmem:[%s943_s15 + $0x158] sm:$0xff]  ;;  %v329_v21 = vadd.f32 10.0, %v201_v16  ;;  %v204_v22 = vld [vmem:[%s943_s15 + $0x160] sm:$0xff]  ;;  %v330_v23 = vadd.f32 10.0, %v202_v18  ;;  %v205_v24 = vld [vmem:[%s943_s15 + $0x168] sm:$0xff] }
  0x34   : > { %431 = vst [vmem:[%s956_s16 + $0x78] sm:$0xff] %v303_v33  ;;  %v331_v25 = vadd.f32 10.0, %v203_v20  ;;  %v206_v26 = vld [vmem:[%s943_s15 + $0x170] sm:$0xff]  ;;  %v332_v27 = vadd.f32 10.0, %v204_v22  ;;  %v207_v28 = vld [vmem:[%s943_s15 + $0x178] sm:$0xff]  ;;  %v333_v29 = vadd.f32 10.0, %v205_v24 }
  0x35   : > { %432 = vst [vmem:[%s956_s16 + $0x80] sm:$0xff] %v304_v35  ;;  %v208_v30 = vld [vmem:[%s943_s15 + $0x180] sm:$0xff]  ;;  %v334_v31 = vadd.f32 10.0, %v206_v26  ;;  %v209_v32 = vld [vmem:[%s943_s15 + $0x188] sm:$0xff]  ;;  %v335_v33 = vadd.f32 10.0, %v207_v28  ;;  %v210_v34 = vld [vmem:[%s943_s15 + $0x190] sm:$0xff] }
  0x36   : > { %433 = vst [vmem:[%s956_s16 + $0x88] sm:$0xff] %v305_v37  ;;  %v336_v35 = vadd.f32 10.0, %v208_v30  ;;  %v211_v36 = vld [vmem:[%s943_s15 + $0x198] sm:$0xff]  ;;  %v337_v37 = vadd.f32 10.0, %v209_v32  ;;  %v212_v38 = vld [vmem:[%s943_s15 + $0x1a0] sm:$0xff]  ;;  %v213_v40 = vld [vmem:[%s943_s15 + $0x1a8] sm:$0xff] }
  0x37   : > { %434 = vst [vmem:[%s956_s16 + $0x90] sm:$0xff] %v306_v39  ;;  %v338_v39 = vadd.f32 10.0, %v210_v34  ;;  %v214_v42 = vld [vmem:[%s943_s15 + $0x1b0] sm:$0xff]  ;;  %v215_v44 = vld [vmem:[%s943_s15 + $0x1b8] sm:$0xff]  ;;  %v216_v46 = vld [vmem:[%s943_s15 + $0x1c0] sm:$0xff]  ;;  %s562_s24 = sshll.u32 %s559_s23, 4  ;;  %s563_s24 = int_to_ptr.hbm [resolvable:$true] %s562_s24 }
  0x38   : > { %435 = vst [vmem:[%s956_s16 + $0x98] sm:$0xff] %v307_v41  ;;  %v339_v41 = vadd.f32 10.0, %v211_v36  ;;  %v217_v48 = vld [vmem:[%s943_s15 + $0x1c8] sm:$0xff]  ;;  %v218_v50 = vld [vmem:[%s943_s15 + $0x1d0] sm:$0xff]  ;;  %v219_v52 = vld [vmem:[%s943_s15 + $0x1d8] sm:$0xff]  ;;  %s545_s25 = scalar_lea.sflag [#allocation4], %s939_s5 }
  0x39   : > { %436 = vst [vmem:[%s956_s16 + $0xa0] sm:$0xff] %v308_v43  ;;  %v340_v43 = vadd.f32 10.0, %v212_v38  ;;  %v220_v54 = vld [vmem:[%s943_s15 + $0x1e0] sm:$0xff]  ;;  %v221_v56 = vld [vmem:[%s943_s15 + $0x1e8] sm:$0xff]  ;;  %v222_v58 = vld [vmem:[%s943_s15 + $0x1f0] sm:$0xff]  ;;  %s781_s26 = sshra.s32 %s563_s24, 4  ;;  %s782_s26 = int_to_ptr.hbm [resolvable:$true] %s781_s26 }
  0x3a   : > { %437 = vst [vmem:[%s956_s16 + $0xa8] sm:$0xff] %v309_v45  ;;  %v341_v45 = vadd.f32 10.0, %v213_v40  ;;  %v223_v60 = vld [vmem:[%s943_s15 + $0x1f8] sm:$0xff]  ;;  %v224_v62 = vld [vmem:[%s943_s15 + $0x200] sm:$0xff]  ;;  %v225_v0 = vld [vmem:[%s943_s15 + $0x208] sm:$0xff]  ;;  %s783_s27 = scalar_lea.hbm %s782_s26, 1024  ;;  %p788_p7 = scmp.lt.s32.totalorder %s782_s26, %s1247_s1 }
  0x3b   : > { %438 = vst [vmem:[%s956_s16 + $0xb0] sm:$0xff] %v310_v47  ;;  %v342_v47 = vadd.f32 10.0, %v214_v42  ;;  %v226_v2 = vld [vmem:[%s943_s15 + $0x210] sm:$0xff]  ;;  %v227_v4 = vld [vmem:[%s943_s15 + $0x218] sm:$0xff]  ;;  %v228_v6 = vld [vmem:[%s943_s15 + $0x220] sm:$0xff]  ;;  %p784_p4 = scmp.ne.s32.totalorder %s782_s26, %s783_s27  ;;  %s787_s30 = scalar_lea.hbm %s1247_s1, 2048 }
  0x3c   : > { %439 = vst [vmem:[%s956_s16 + $0xb8] sm:$0xff] %v311_v49  ;;  %v343_v49 = vadd.f32 10.0, %v215_v44  ;;  %v229_v8 = vld [vmem:[%s943_s15 + $0x228] sm:$0xff]  ;;  %v230_v10 = vld [vmem:[%s943_s15 + $0x230] sm:$0xff]  ;;  %v231_v12 = vld [vmem:[%s943_s15 + $0x238] sm:$0xff]  ;;  %p789_p8 = scmp.lt.s32.totalorder %s787_s30, %s783_s27 }
  0x3d   : > { %440 = vst [vmem:[%s956_s16 + $0xc0] sm:$0xff] %v312_v51  ;;  %v344_v51 = vadd.f32 10.0, %v216_v46  ;;  %v232_v14 = vld [vmem:[%s943_s15 + $0x240] sm:$0xff]  ;;  %v233_v16 = vld [vmem:[%s943_s15 + $0x248] sm:$0xff]  ;;  %v234_v18 = vld [vmem:[%s943_s15 + $0x250] sm:$0xff]  ;;  %p785_p5 = pnand %p784_p4, %p916_p9 }
  0x3e   : > { %441 = vst [vmem:[%s956_s16 + $0xc8] sm:$0xff] %v313_v53  ;;  %v345_v53 = vadd.f32 10.0, %v217_v48  ;;  %v235_v20 = vld [vmem:[%s943_s15 + $0x258] sm:$0xff]  ;;  %v236_v22 = vld [vmem:[%s943_s15 + $0x260] sm:$0xff]  ;;  %v237_v24 = vld [vmem:[%s943_s15 + $0x268] sm:$0xff]  ;;  %p790_p10 = por %p789_p8, %p788_p7 }
  0x3f   : > { %442 = vst [vmem:[%s956_s16 + $0xd0] sm:$0xff] %v314_v55  ;;  %v346_v55 = vadd.f32 10.0, %v218_v50  ;;  %v238_v26 = vld [vmem:[%s943_s15 + $0x270] sm:$0xff]  ;;  %v239_v28 = vld [vmem:[%s943_s15 + $0x278] sm:$0xff]  ;;  %v240_v30 = vld [vmem:[%s943_s15 + $0x280] sm:$0xff]  ;;  %p786_p6 = pneg %p785_p5 }
  0x40   : > { %443 = vst [vmem:[%s956_s16 + $0xd8] sm:$0xff] %v315_v57  ;;  %v347_v57 = vadd.f32 10.0, %v219_v52  ;;  %v241_v32 = vld [vmem:[%s943_s15 + $0x288] sm:$0xff]  ;;  %v242_v34 = vld [vmem:[%s943_s15 + $0x290] sm:$0xff]  ;;  %v243_v36 = vld [vmem:[%s943_s15 + $0x298] sm:$0xff] }
  0x41   : > { %444 = vst [vmem:[%s956_s16 + $0xe0] sm:$0xff] %v316_v59  ;;  %v348_v59 = vadd.f32 10.0, %v220_v54  ;;  %v244_v38 = vld [vmem:[%s943_s15 + $0x2a0] sm:$0xff]  ;;  %v245_v40 = vld [vmem:[%s943_s15 + $0x2a8] sm:$0xff]  ;;  %v246_v42 = vld [vmem:[%s943_s15 + $0x2b0] sm:$0xff]  ;;  %p791_p13 = pnand %p790_p10, %p786_p6 }
  0x42   : > { %445 = vst [vmem:[%s956_s16 + $0xe8] sm:$0xff] %v317_v61  ;;  %v349_v61 = vadd.f32 10.0, %v221_v56  ;;  %v247_v44 = vld [vmem:[%s943_s15 + $0x2b8] sm:$0xff]  ;;  %v248_v46 = vld [vmem:[%s943_s15 + $0x2c0] sm:$0xff]  ;;  %v249_v48 = vld [vmem:[%s943_s15 + $0x2c8] sm:$0xff] }
  0x43   : > { %446 = vst [vmem:[%s956_s16 + $0xf0] sm:$0xff] %v318_v63  ;;  %v350_v63 = vadd.f32 10.0, %v222_v58  ;;  %v250_v50 = vld [vmem:[%s943_s15 + $0x2d0] sm:$0xff]  ;;  %v251_v52 = vld [vmem:[%s943_s15 + $0x2d8] sm:$0xff]  ;;  %v252_v54 = vld [vmem:[%s943_s15 + $0x2e0] sm:$0xff] }
  0x44   : > { %447 = vst [vmem:[%s956_s16 + $0xf8] sm:$0xff] %v319_v1  ;;  %v351_v1 = vadd.f32 10.0, %v223_v60  ;;  %v253_v56 = vld [vmem:[%s943_s15 + $0x2e8] sm:$0xff]  ;;  %v254_v58 = vld [vmem:[%s943_s15 + $0x2f0] sm:$0xff]  ;;  %v255_v60 = vld [vmem:[%s943_s15 + $0x2f8] sm:$0xff] }
  0x45   : > { %448 = vst [vmem:[%s956_s16 + $0x100] sm:$0xff] %v320_v3  ;;  %v352_v3 = vadd.f32 10.0, %v224_v62  ;;  %v256_v62 = vld [vmem:[%s943_s15 + $0x300] sm:$0xff] }
  0x46   : > { %449 = vst [vmem:[%s956_s16 + $0x108] sm:$0xff] %v321_v5  ;;  %v353_v5 = vadd.f32 10.0, %v225_v0  ;;  %v257_v0 = vld [vmem:[%s943_s15 + $0x308] sm:$0xff] }
  0x47   : > { %450 = vst [vmem:[%s956_s16 + $0x110] sm:$0xff] %v322_v7  ;;  %v354_v7 = vadd.f32 10.0, %v226_v2  ;;  %v258_v2 = vld [vmem:[%s943_s15 + $0x310] sm:$0xff] }
  0x48   : > { %451 = vst [vmem:[%s956_s16 + $0x118] sm:$0xff] %v323_v9  ;;  %v355_v9 = vadd.f32 10.0, %v227_v4  ;;  %v259_v4 = vld [vmem:[%s943_s15 + $0x318] sm:$0xff] }
  0x49   : > { %452 = vst [vmem:[%s956_s16 + $0x120] sm:$0xff] %v324_v11  ;;  %v356_v11 = vadd.f32 10.0, %v228_v6  ;;  %v260_v6 = vld [vmem:[%s943_s15 + $0x320] sm:$0xff] }
  0x4a   : > { %453 = vst [vmem:[%s956_s16 + $0x128] sm:$0xff] %v325_v13  ;;  %v357_v13 = vadd.f32 10.0, %v229_v8  ;;  %v261_v8 = vld [vmem:[%s943_s15 + $0x328] sm:$0xff] }
  0x4b   : > { %454 = vst [vmem:[%s956_s16 + $0x130] sm:$0xff] %v326_v15  ;;  %v358_v15 = vadd.f32 10.0, %v230_v10  ;;  %v262_v10 = vld [vmem:[%s943_s15 + $0x330] sm:$0xff] }
  0x4c   : > { %455 = vst [vmem:[%s956_s16 + $0x138] sm:$0xff] %v327_v17  ;;  %v359_v17 = vadd.f32 10.0, %v231_v12  ;;  %v263_v12 = vld [vmem:[%s943_s15 + $0x338] sm:$0xff] }
  0x4d   : > { %456 = vst [vmem:[%s956_s16 + $0x140] sm:$0xff] %v328_v19  ;;  %v360_v19 = vadd.f32 10.0, %v232_v14  ;;  %v264_v14 = vld [vmem:[%s943_s15 + $0x340] sm:$0xff] }
  0x4e   : > { %457 = vst [vmem:[%s956_s16 + $0x148] sm:$0xff] %v329_v21  ;;  %v361_v21 = vadd.f32 10.0, %v233_v16  ;;  %v265_v16 = vld [vmem:[%s943_s15 + $0x348] sm:$0xff] }
  0x4f   : > { %458 = vst [vmem:[%s956_s16 + $0x150] sm:$0xff] %v330_v23  ;;  %v362_v23 = vadd.f32 10.0, %v234_v18  ;;  %v266_v18 = vld [vmem:[%s943_s15 + $0x350] sm:$0xff] }
  0x50   : > { %459 = vst [vmem:[%s956_s16 + $0x158] sm:$0xff] %v331_v25  ;;  %v363_v25 = vadd.f32 10.0, %v235_v20  ;;  %v267_v20 = vld [vmem:[%s943_s15 + $0x358] sm:$0xff] }
  0x51   : > { %460 = vst [vmem:[%s956_s16 + $0x160] sm:$0xff] %v332_v27  ;;  %v364_v27 = vadd.f32 10.0, %v236_v22  ;;  %v268_v22 = vld [vmem:[%s943_s15 + $0x360] sm:$0xff] }
  0x52   : > { %461 = vst [vmem:[%s956_s16 + $0x168] sm:$0xff] %v333_v29  ;;  %v365_v29 = vadd.f32 10.0, %v237_v24  ;;  %v269_v24 = vld [vmem:[%s943_s15 + $0x368] sm:$0xff] }
  0x53   : > { %462 = vst [vmem:[%s956_s16 + $0x170] sm:$0xff] %v334_v31  ;;  %v366_v31 = vadd.f32 10.0, %v238_v26  ;;  %v270_v26 = vld [vmem:[%s943_s15 + $0x370] sm:$0xff] }
  0x54   : > { %463 = vst [vmem:[%s956_s16 + $0x178] sm:$0xff] %v335_v33  ;;  %v367_v33 = vadd.f32 10.0, %v239_v28  ;;  %v271_v28 = vld [vmem:[%s943_s15 + $0x378] sm:$0xff] }
  0x55   : > { %464 = vst [vmem:[%s956_s16 + $0x180] sm:$0xff] %v336_v35  ;;  %v368_v35 = vadd.f32 10.0, %v240_v30  ;;  %v272_v30 = vld [vmem:[%s943_s15 + $0x380] sm:$0xff] }
  0x56   : > { %465 = vst [vmem:[%s956_s16 + $0x188] sm:$0xff] %v337_v37  ;;  %v369_v37 = vadd.f32 10.0, %v241_v32  ;;  %v273_v32 = vld [vmem:[%s943_s15 + $0x388] sm:$0xff] }
  0x57   : > { %466 = vst [vmem:[%s956_s16 + $0x190] sm:$0xff] %v338_v39  ;;  %v370_v39 = vadd.f32 10.0, %v242_v34  ;;  %v274_v34 = vld [vmem:[%s943_s15 + $0x390] sm:$0xff] }
  0x58   : > { %467 = vst [vmem:[%s956_s16 + $0x198] sm:$0xff] %v339_v41  ;;  %v371_v41 = vadd.f32 10.0, %v243_v36  ;;  %v275_v36 = vld [vmem:[%s943_s15 + $0x398] sm:$0xff] }
  0x59   : > { %468 = vst [vmem:[%s956_s16 + $0x1a0] sm:$0xff] %v340_v43  ;;  %v372_v43 = vadd.f32 10.0, %v244_v38  ;;  %v276_v38 = vld [vmem:[%s943_s15 + $0x3a0] sm:$0xff] }
  0x5a   : > { %469 = vst [vmem:[%s956_s16 + $0x1a8] sm:$0xff] %v341_v45  ;;  %v373_v45 = vadd.f32 10.0, %v245_v40  ;;  %v277_v40 = vld [vmem:[%s943_s15 + $0x3a8] sm:$0xff] }
  0x5b   : > { %470 = vst [vmem:[%s956_s16 + $0x1b0] sm:$0xff] %v342_v47  ;;  %v374_v47 = vadd.f32 10.0, %v246_v42  ;;  %v278_v42 = vld [vmem:[%s943_s15 + $0x3b0] sm:$0xff] }
  0x5c   : > { %471 = vst [vmem:[%s956_s16 + $0x1b8] sm:$0xff] %v343_v49  ;;  %v375_v49 = vadd.f32 10.0, %v247_v44  ;;  %v279_v44 = vld [vmem:[%s943_s15 + $0x3b8] sm:$0xff] }
  0x5d   : > { %472 = vst [vmem:[%s956_s16 + $0x1c0] sm:$0xff] %v344_v51  ;;  %v376_v51 = vadd.f32 10.0, %v248_v46  ;;  %v280_v46 = vld [vmem:[%s943_s15 + $0x3c0] sm:$0xff] }
  0x5e   : > { %473 = vst [vmem:[%s956_s16 + $0x1c8] sm:$0xff] %v345_v53  ;;  %v377_v53 = vadd.f32 10.0, %v249_v48  ;;  %v281_v48 = vld [vmem:[%s943_s15 + $0x3c8] sm:$0xff] }
  0x5f   : > { %474 = vst [vmem:[%s956_s16 + $0x1d0] sm:$0xff] %v346_v55  ;;  %v378_v55 = vadd.f32 10.0, %v250_v50  ;;  %v282_v50 = vld [vmem:[%s943_s15 + $0x3d0] sm:$0xff] }
  0x60   : > { %475 = vst [vmem:[%s956_s16 + $0x1d8] sm:$0xff] %v347_v57  ;;  %v379_v57 = vadd.f32 10.0, %v251_v52  ;;  %v283_v52 = vld [vmem:[%s943_s15 + $0x3d8] sm:$0xff] }
  0x61   : > { %476 = vst [vmem:[%s956_s16 + $0x1e0] sm:$0xff] %v348_v59  ;;  %v380_v59 = vadd.f32 10.0, %v252_v54  ;;  %v284_v54 = vld [vmem:[%s943_s15 + $0x3e0] sm:$0xff] }
  0x62   : > { %477 = vst [vmem:[%s956_s16 + $0x1e8] sm:$0xff] %v349_v61  ;;  %v381_v61 = vadd.f32 10.0, %v253_v56  ;;  %v285_v56 = vld [vmem:[%s943_s15 + $0x3e8] sm:$0xff] }
  0x63   : > { %478 = vst [vmem:[%s956_s16 + $0x1f0] sm:$0xff] %v350_v63  ;;  %v382_v63 = vadd.f32 10.0, %v254_v58  ;;  %v286_v58 = vld [vmem:[%s943_s15 + $0x3f0] sm:$0xff] }
  0x64   : > { %479 = vst [vmem:[%s956_s16 + $0x1f8] sm:$0xff] %v351_v1  ;;  %v383_v1 = vadd.f32 10.0, %v255_v60  ;;  %v287_v60 = vld [vmem:[%s943_s15 + $0x3f8] sm:$0xff] }
  0x65   : > { %480 = vst [vmem:[%s956_s16 + $0x200] sm:$0xff] %v352_v3  ;;  %v384_v3 = vadd.f32 10.0, %v256_v62  ;;  %v414_v62 = vadd.f32 10.0, %v286_v58 }
  0x66   : > { %481 = vst [vmem:[%s956_s16 + $0x208] sm:$0xff] %v353_v5  ;;  %v385_v5 = vadd.f32 10.0, %v257_v0 }
  0x67   : > { %482 = vst [vmem:[%s956_s16 + $0x210] sm:$0xff] %v354_v7  ;;  %v386_v7 = vadd.f32 10.0, %v258_v2 }
  0x68   : > { %483 = vst [vmem:[%s956_s16 + $0x218] sm:$0xff] %v355_v9  ;;  %v387_v9 = vadd.f32 10.0, %v259_v4 }
  0x69   : > { %484 = vst [vmem:[%s956_s16 + $0x220] sm:$0xff] %v356_v11  ;;  %v388_v11 = vadd.f32 10.0, %v260_v6 }
  0x6a   : > { %485 = vst [vmem:[%s956_s16 + $0x228] sm:$0xff] %v357_v13  ;;  %v389_v13 = vadd.f32 10.0, %v261_v8 }
  0x6b   : > { %486 = vst [vmem:[%s956_s16 + $0x230] sm:$0xff] %v358_v15  ;;  %v390_v15 = vadd.f32 10.0, %v262_v10 }
  0x6c   : > { %487 = vst [vmem:[%s956_s16 + $0x238] sm:$0xff] %v359_v17  ;;  %v391_v17 = vadd.f32 10.0, %v263_v12 }
  0x6d   : > { %488 = vst [vmem:[%s956_s16 + $0x240] sm:$0xff] %v360_v19  ;;  %v392_v19 = vadd.f32 10.0, %v264_v14 }
  0x6e   : > { %489 = vst [vmem:[%s956_s16 + $0x248] sm:$0xff] %v361_v21  ;;  %v393_v21 = vadd.f32 10.0, %v265_v16 }
  0x6f   : > { %490 = vst [vmem:[%s956_s16 + $0x250] sm:$0xff] %v362_v23  ;;  %v394_v23 = vadd.f32 10.0, %v266_v18 }
  0x70   : > { %491 = vst [vmem:[%s956_s16 + $0x258] sm:$0xff] %v363_v25  ;;  %v395_v25 = vadd.f32 10.0, %v267_v20 }
  0x71   : > { %492 = vst [vmem:[%s956_s16 + $0x260] sm:$0xff] %v364_v27  ;;  %v396_v27 = vadd.f32 10.0, %v268_v22 }
  0x72   : > { %493 = vst [vmem:[%s956_s16 + $0x268] sm:$0xff] %v365_v29  ;;  %v397_v29 = vadd.f32 10.0, %v269_v24 }
  0x73   : > { %494 = vst [vmem:[%s956_s16 + $0x270] sm:$0xff] %v366_v31  ;;  %v398_v31 = vadd.f32 10.0, %v270_v26 }
  0x74   : > { %495 = vst [vmem:[%s956_s16 + $0x278] sm:$0xff] %v367_v33  ;;  %v399_v33 = vadd.f32 10.0, %v271_v28 }
  0x75   : > { %496 = vst [vmem:[%s956_s16 + $0x280] sm:$0xff] %v368_v35  ;;  %v400_v35 = vadd.f32 10.0, %v272_v30 }
  0x76   : > { %497 = vst [vmem:[%s956_s16 + $0x288] sm:$0xff] %v369_v37  ;;  %v401_v37 = vadd.f32 10.0, %v273_v32 }
  0x77   : > { %498 = vst [vmem:[%s956_s16 + $0x290] sm:$0xff] %v370_v39  ;;  %v402_v39 = vadd.f32 10.0, %v274_v34 }
  0x78   : > { %499 = vst [vmem:[%s956_s16 + $0x298] sm:$0xff] %v371_v41  ;;  %v403_v41 = vadd.f32 10.0, %v275_v36 }
  0x79   : > { %500 = vst [vmem:[%s956_s16 + $0x2a0] sm:$0xff] %v372_v43  ;;  %v404_v43 = vadd.f32 10.0, %v276_v38 }
  0x7a   : > { %501 = vst [vmem:[%s956_s16 + $0x2a8] sm:$0xff] %v373_v45  ;;  %v405_v45 = vadd.f32 10.0, %v277_v40 }
  0x7b   : > { %502 = vst [vmem:[%s956_s16 + $0x2b0] sm:$0xff] %v374_v47  ;;  %v406_v47 = vadd.f32 10.0, %v278_v42 }
  0x7c   : > { %503 = vst [vmem:[%s956_s16 + $0x2b8] sm:$0xff] %v375_v49  ;;  %v407_v49 = vadd.f32 10.0, %v279_v44 }
  0x7d   : > { %504 = vst [vmem:[%s956_s16 + $0x2c0] sm:$0xff] %v376_v51  ;;  %v408_v51 = vadd.f32 10.0, %v280_v46 }
  0x7e   : > { %505 = vst [vmem:[%s956_s16 + $0x2c8] sm:$0xff] %v377_v53  ;;  %v409_v53 = vadd.f32 10.0, %v281_v48 }
  0x7f   : > { %506 = vst [vmem:[%s956_s16 + $0x2d0] sm:$0xff] %v378_v55  ;;  %v410_v55 = vadd.f32 10.0, %v282_v50 }
  0x80   : > { %507 = vst [vmem:[%s956_s16 + $0x2d8] sm:$0xff] %v379_v57  ;;  %v411_v57 = vadd.f32 10.0, %v283_v52 }
  0x81   : > { %508 = vst [vmem:[%s956_s16 + $0x2e0] sm:$0xff] %v380_v59  ;;  %v412_v59 = vadd.f32 10.0, %v284_v54 }
  0x82   : > { %509 = vst [vmem:[%s956_s16 + $0x2e8] sm:$0xff] %v381_v61  ;;  %v413_v61 = vadd.f32 10.0, %v285_v56 }
  0x83   : > { %510 = vst [vmem:[%s956_s16 + $0x2f0] sm:$0xff] %v382_v63  ;;  %v415_v63 = vadd.f32 10.0, %v287_v60 }
  0x84   : > { %511 = vst [vmem:[%s956_s16 + $0x2f8] sm:$0xff] %v383_v1 }
  0x85   : > { %512 = vst [vmem:[%s956_s16 + $0x300] sm:$0xff] %v384_v3 }
  0x86   : > { %513 = vst [vmem:[%s956_s16 + $0x308] sm:$0xff] %v385_v5 }
  0x87   : > { %514 = vst [vmem:[%s956_s16 + $0x310] sm:$0xff] %v386_v7 }
  0x88   : > { %515 = vst [vmem:[%s956_s16 + $0x318] sm:$0xff] %v387_v9 }
  0x89   : > { %516 = vst [vmem:[%s956_s16 + $0x320] sm:$0xff] %v388_v11 }
  0x8a   : > { %517 = vst [vmem:[%s956_s16 + $0x328] sm:$0xff] %v389_v13 }
  0x8b   : > { %518 = vst [vmem:[%s956_s16 + $0x330] sm:$0xff] %v390_v15 }
  0x8c   : > { %519 = vst [vmem:[%s956_s16 + $0x338] sm:$0xff] %v391_v17 }
  0x8d   : > { %520 = vst [vmem:[%s956_s16 + $0x340] sm:$0xff] %v392_v19 }
  0x8e   : > { %521 = vst [vmem:[%s956_s16 + $0x348] sm:$0xff] %v393_v21 }
  0x8f   : > { %522 = vst [vmem:[%s956_s16 + $0x350] sm:$0xff] %v394_v23 }
  0x90   : > { %523 = vst [vmem:[%s956_s16 + $0x358] sm:$0xff] %v395_v25 }
  0x91   : > { %524 = vst [vmem:[%s956_s16 + $0x360] sm:$0xff] %v396_v27 }
  0x92   : > { %525 = vst [vmem:[%s956_s16 + $0x368] sm:$0xff] %v397_v29 }
  0x93   : > { %526 = vst [vmem:[%s956_s16 + $0x370] sm:$0xff] %v398_v31 }
  0x94   : > { %527 = vst [vmem:[%s956_s16 + $0x378] sm:$0xff] %v399_v33 }
  0x95   : > { %528 = vst [vmem:[%s956_s16 + $0x380] sm:$0xff] %v400_v35 }
  0x96   : > { %529 = vst [vmem:[%s956_s16 + $0x388] sm:$0xff] %v401_v37 }
  0x97   : > { %530 = vst [vmem:[%s956_s16 + $0x390] sm:$0xff] %v402_v39 }
  0x98   : > { %531 = vst [vmem:[%s956_s16 + $0x398] sm:$0xff] %v403_v41 }
  0x99   : > { %532 = vst [vmem:[%s956_s16 + $0x3a0] sm:$0xff] %v404_v43 }
  0x9a   : > { %533 = vst [vmem:[%s956_s16 + $0x3a8] sm:$0xff] %v405_v45 }
  0x9b   : > { %534 = vst [vmem:[%s956_s16 + $0x3b0] sm:$0xff] %v406_v47 }
  0x9c   : > { %535 = vst [vmem:[%s956_s16 + $0x3b8] sm:$0xff] %v407_v49 }
  0x9d   : > { %536 = vst [vmem:[%s956_s16 + $0x3c0] sm:$0xff] %v408_v51 }
  0x9e   : > { %537 = vst [vmem:[%s956_s16 + $0x3c8] sm:$0xff] %v409_v53 }
  0x9f   : > { %538 = vst [vmem:[%s956_s16 + $0x3d0] sm:$0xff] %v410_v55 }
  0xa0   : > { %539 = vst [vmem:[%s956_s16 + $0x3d8] sm:$0xff] %v411_v57 }
  0xa1   : > { %540 = vst [vmem:[%s956_s16 + $0x3e0] sm:$0xff] %v412_v59 }
  0xa2   : > { %541 = vst [vmem:[%s956_s16 + $0x3e8] sm:$0xff] %v413_v61 }
  0xa3   : > { %542 = vst [vmem:[%s956_s16 + $0x3f0] sm:$0xff] %v414_v62 }
  0xa4   : > { %543 = vst [vmem:[%s956_s16 + $0x3f8] sm:$0xff] %v415_v63 }
  0xa5   : > { %794 = shalt.err (!%p791_p13)
}
  0xa6   : > { %s853_s4 = smov 1024   ;;  %s854_s5 = smov 64  }
  0xa7   : > { %673 = dma.vmem_to_hbm [thread:$0]  (%p916_p9), %s561_s9, 16384, %s563_s24, %s545_s25, %s853_s4, %s853_s4, %s854_s5  }
  0xa8 PF: > { %s577_s12 = sand.u32 1, %s829_s6   ;;  %p680_p0 = pnand %p653_p12, %p923_p11 }
  0xa9   : > { %s578_s13 = scalar_lea.sflag [#allocation4], %s577_s12 }
  0xaa   : > { %p681_p1 = pneg %p680_p0 }
  0xac   : > { %824 = dma.done.wait (%p681_p1), %s578_s13, 16384  }
  0xad   : > { %826 = vsyncadd (%p681_p1), %s578_s13, 4294950912  ;;  %s17_s11 = sadd.s32 1, %s849_s11   ;;  %s1252_s6 = smov %s833_s7 }
  0xae   : > { %p14_p2 = scmp.ge.s32.totalorder %s17_s11, 4   ;;  %s1253_s7 = smov %s837_s8 }
  0xaf   : > { %s1254_s8 = smov %s921_s20  ;;  %s1255_s9 = smov %s845_s10 }
  0xb0   : > { %s1256_s10 = smov %s1258_s14  ;;  %16 = sbr.rel (!%p14_p2) target bundleno = 6 (0x6), region = 69 }
  0xb5   :  { %584 = vsyncpa [#allocation3], 1 }
  0xb6   :  { %586 = vsyncpa [#allocation3 + $0x1], 1 }
  0xb7   :  { %587 = vsyncpa [#allocation4], 1 }
  0xb8   :  { %589 = vsyncpa [#allocation4 + $0x1], 1 }

</bundles_post_ra>
